<compile_context>
chip_gen: v5e
topology: v5e:2x2
jax: 0.10.0
libtpu: 0.0.40
codegen_flags: <defaults>
</compile_context>

<pallas_src>
import jax
import jax.numpy as jnp
from jax.experimental import pallas as pl
from jax.experimental.pallas import tpu as pltpu

B, S, IN_DIM, WIDTH, MODES = 2, 16, 2, 32, 8   # modes <= S//2 + 1


# ----------------------------- Pallas kernel --------------------------------
def fno1d_kernel(x_ref,
                 a0_ref, c0_ref,
                 a1_ref, c1_ref,
                 fc2_ref, b2_ref,
                 o_ref):
    f32 = jnp.float32
    bf16 = jnp.bfloat16

    def mm(a, w_ref):
        # bf16 MXU operands, f32 accumulation.
        return jnp.dot(a.astype(bf16), w_ref[...], preferred_element_type=f32)

    x = x_ref[0]                                            # (Bblk, S*IN_DIM) f32
    # fused (fc0 -> spectral_conv0 + 1x1 conv0) + ReLU
    h = jnp.maximum(mm(x, a0_ref) + c0_ref[...], 0.0)       # (Bblk, S*W)
    # fused (spectral_conv1 + 1x1 conv1 -> fc1) + ReLU
    h = jnp.maximum(mm(h, a1_ref) + c1_ref[...], 0.0)       # (Bblk, S*W)
    # fc2, lane-padded to 128 output columns (lane-dense store)
    o_ref[0] = mm(h, fc2_ref) + b2_ref[...]                 # (Bblk, NPAD)


# ------------------------------- wrapper -------------------------------------
def _num_batch_blocks(m_rows):
    # Only split the batch across TensorCores when each core gets a reasonable
    # M tile (>=128 rows); never split a tiny batch (that duplicates the
    # weight DMA and degrades matmuls to matrix-vector products).
    try:
        kind = jax.devices()[0].device_kind.lower()
    except Exception:
        kind = ""
    multi_tc = any(tag in kind for tag in ("v7", "tpu7", "7x"))
    if multi_tc and m_rows % 2 == 0 and (m_rows // 2) >= 128:
        return 2
    return 1


def fno1d_forward(x, ops):
    b, s, in_dim = x.shape
    x_flat = x.reshape(b, s * in_dim).astype(jnp.float32)

    # Pad batch rows to a multiple of 8 (f32 sublanes); sliced off afterwards.
    m = max(8, ((b + 7) // 8) * 8)
    if m != b:
        x_flat = jnp.pad(x_flat, ((0, m - b), (0, 0)))

    g = _num_batch_blocks(m)
    bblk = m // g
    x_blk = x_flat.reshape(g, bblk, s * in_dim)

    w_keys = ['A0', 'C0', 'A1', 'C1', 'FC2', 'B2']
    w_args = [ops[k] for k in w_keys]

    in_specs = [pl.BlockSpec((1, bblk, s * in_dim), lambda i: (i, 0, 0))]
    for a in w_args:
        # constant index_map -> weights are DMAed once, not per grid step
        in_specs.append(
            pl.BlockSpec(a.shape, lambda i, nd=a.ndim: (0,) * nd))

    npad = ops['FC2'].shape[1]                              # 128 (lane-dense)
    out = pl.pallas_call(
        fno1d_kernel,
        out_shape=jax.ShapeDtypeStruct((g, bblk, npad), jnp.float32),
        grid=(g,),
        in_specs=in_specs,
        out_specs=pl.BlockSpec((1, bblk, npad), lambda i: (i, 0, 0)),
        compiler_params=pltpu.CompilerParams(
            dimension_semantics=("parallel",)),
    )(x_blk, *w_args)

    out = out.reshape(m, npad)[:b, :s]
    return out.reshape(b, s, 1)


# ----------------------- operator precompute (wrapper) -----------------------
def build_operators(p, s, modes, in_dim, width):
    eye_s = jnp.eye(s, dtype=jnp.float32)

    def spectral_plus_conv_op(wr, wi, ww):
        # Dense (s*width, s*width) matrix M with  flat(out) = flat(h) @ M,
        # where out = irfft(mode_mix(rfft(h))) + h @ ww  (row-major flatten).
        w_cplx = (wr + 1j * wi).astype(jnp.complex64)       # (modes, in, out)

        def apply(h_flat):
            h = h_flat.reshape(s, width)                    # (s, c)
            hc = h.T                                        # (c, s) channels-first
            xft = jnp.fft.rfft(hc, axis=-1)[:, :modes]      # (in, modes)
            yft = jnp.einsum('ik,kio->ok', xft, w_cplx)     # (out, modes)
            out_ft = jnp.zeros((width, s // 2 + 1), jnp.complex64)
            out_ft = out_ft.at[:, :modes].set(yft)
            spec = jnp.fft.irfft(out_ft, n=s, axis=-1).T    # (s, out)
            return (spec + h @ ww).reshape(-1)

        return jax.vmap(apply)(jnp.eye(s * width, dtype=jnp.float32))

    def tile_bias(bvec):
        return jnp.tile(bvec.reshape(-1), (s,))[None, :]    # (1, s*out)

    # --- per-stage operators (all f32) ---
    fc0 = jnp.kron(eye_s, p['fc0_w'])                       # (s*in_dim, s*w)
    b0 = tile_bias(p['fc0_b'])
    op0 = spectral_plus_conv_op(p['wr0'], p['wi0'], p['w0_w'])
    bop0 = tile_bias(p['w0_b'])
    op1 = spectral_plus_conv_op(p['wr1'], p['wi1'], p['w1_w'])
    bop1 = tile_bias(p['w1_b'])
    fc1 = jnp.kron(eye_s, p['fc1_w'])                       # (s*w, s*w)
    b1 = tile_bias(p['fc1_b'])
    fc2 = jnp.kron(eye_s, p['fc2_w'])                       # (s*w, s)
    b2 = tile_bias(p['fc2_b'])                              # (1, s)

    # --- algebraic fusion of adjacent linear stages (compose in f32) ---
    a0 = fc0 @ op0                                          # (s*in_dim, s*w)
    c0 = b0 @ op0 + bop0                                    # (1, s*w)
    a1 = op1 @ fc1                                          # (s*w, s*w)
    c1 = bop1 @ fc1 + b1                                    # (1, s*w)

    # --- lane-dense final projection: pad output columns to a multiple of 128
    npad = ((max(s, 128) + 127) // 128) * 128
    fc2_pad = jnp.zeros((s * width, npad), jnp.float32).at[:, :s].set(fc2)
    b2_pad = jnp.zeros((1, npad), jnp.float32).at[:, :s].set(b2)

    # Single bf16 cast of the composed MXU operands; biases stay f32.
    return {
        'A0': a0.astype(jnp.bfloat16), 'C0': c0,
        'A1': a1.astype(jnp.bfloat16), 'C1': c1,
        'FC2': fc2_pad.astype(jnp.bfloat16), 'B2': b2_pad,
    }


# --------------------------- parameter setup ---------------------------------
def init_params(key, in_dim, width, modes):
    ks = jax.random.split(key, 14)
    u = lambda k_, shape, sc: jax.random.uniform(k_, shape, jnp.float32, -sc, sc)
    r = lambda k_, shape: jax.random.uniform(k_, shape, jnp.float32)  # [0,1)
    spec_scale = 1.0 / (width * width)
    return {
        # nn.Linear weights stored pre-transposed: (in, out)
        'fc0_w': u(ks[0], (in_dim, width), 1.0 / jnp.sqrt(in_dim)),
        'fc0_b': u(ks[1], (1, width), 1.0 / jnp.sqrt(in_dim)),
        # SpectralConv complex weights, layout (modes, in, out)
        'wr0': spec_scale * r(ks[2], (modes, width, width)),
        'wi0': spec_scale * r(ks[3], (modes, width, width)),
        'wr1': spec_scale * r(ks[4], (modes, width, width)),
        'wi1': spec_scale * r(ks[5], (modes, width, width)),
        # Conv1d(k=1) weights stored pre-transposed: (in, out)
        'w0_w': u(ks[6], (width, width), 1.0 / jnp.sqrt(width)),
        'w0_b': u(ks[7], (1, width), 1.0 / jnp.sqrt(width)),
        'w1_w': u(ks[8], (width, width), 1.0 / jnp.sqrt(width)),
        'w1_b': u(ks[9], (1, width), 1.0 / jnp.sqrt(width)),
        'fc1_w': u(ks[10], (width, width), 1.0 / jnp.sqrt(width)),
        'fc1_b': u(ks[11], (1, width), 1.0 / jnp.sqrt(width)),
        'fc2_w': u(ks[12], (width, 1), 1.0 / jnp.sqrt(width)),
        'fc2_b': u(ks[13], (1, 1), 1.0 / jnp.sqrt(width)),
    }


# ------------------------ pure-JAX reference (FFT, f32) -----------------------
def fno1d_reference(x, p, modes):
    b, s, _ = x.shape
    h = x @ p['fc0_w'] + p['fc0_b']

    def fourier(h, wr, wi, ww, wb):
        hc = jnp.transpose(h, (0, 2, 1))                        # (B, C, s)
        xft = jnp.fft.rfft(hc, axis=-1)[:, :, :modes]           # (B, C, modes)
        w = (wr + 1j * wi).astype(jnp.complex64)                # (modes, i, o)
        yft = jnp.einsum('bik,kio->bok', xft, w)
        out_ft = jnp.zeros((b, hc.shape[1], s // 2 + 1), jnp.complex64)
        out_ft = out_ft.at[:, :, :modes].set(yft)
        spec = jnp.transpose(jnp.fft.irfft(out_ft, n=s, axis=-1), (0, 2, 1))
        return spec + h @ ww + wb

    h = jax.nn.relu(fourier(h, p['wr0'], p['wi0'], p['w0_w'], p['w0_b']))
    h = fourier(h, p['wr1'], p['wi1'], p['w1_w'], p['w1_b'])
    h = jax.nn.relu(h @ p['fc1_w'] + p['fc1_b'])
    return h @ p['fc2_w'] + p['fc2_b']


# --------------------------------- main ---------------------------------------
if __name__ == "__main__":
    key = jax.random.PRNGKey(0)
    k_x, k_p = jax.random.split(key)
    # input: (batchsize, x=s, c=in_dim) like the PyTorch module
    x = jax.random.normal(k_x, (B, S, IN_DIM), jnp.float32)
    params = init_params(k_p, IN_DIM, WIDTH, MODES)
    ops = build_operators(params, S, MODES, IN_DIM, WIDTH)

    out = fno1d_forward(x, ops)
    out = jax.block_until_ready(out)

    ref = jax.block_until_ready(fno1d_reference(x, params, MODES))
    err = float(jnp.max(jnp.abs(out - ref)))
    assert out.shape == (B, S, 1), out.shape
    # bf16 MXU operands (f32 accumulation) -> slightly relaxed tolerance vs the
    # f32 FFT reference.
    assert err < 5e-2, f"max abs error vs FFT reference: {err}"

    print("KERNEL_OK")
</pallas_src>

<mosaic_0001>
module attributes {stable_mosaic.version = 11 : i64} {
  func.func @fno1d_kernel(%arg0: i32, %arg1: memref<1x8x32xf32, #tpu.memory_space<vmem>>, %arg2: memref<32x512xbf16, #tpu.memory_space<vmem>>, %arg3: memref<1x512xf32, #tpu.memory_space<vmem>>, %arg4: memref<512x512xbf16, #tpu.memory_space<vmem>>, %arg5: memref<1x512xf32, #tpu.memory_space<vmem>>, %arg6: memref<512x128xbf16, #tpu.memory_space<vmem>>, %arg7: memref<1x128xf32, #tpu.memory_space<vmem>>, %arg8: memref<1x8x128xf32, #tpu.memory_space<vmem>>) attributes {dimension_semantics = [#tpu.dimension_semantics<parallel>], iteration_bounds = array<i64: 1>, scalar_prefetch = 0 : i64, scratch_operands = 0 : i64, tpu.core_type = #tpu.core_type<tc>, window_params = [{transform_indices = @transform_0, window_bounds = array<i64: 1, 8, 32>}, {pipeline_mode = #tpu.pipeline_mode<synchronous>, transform_indices = @transform_1, window_bounds = array<i64: 32, 512>}, {pipeline_mode = #tpu.pipeline_mode<synchronous>, transform_indices = @transform_2, window_bounds = array<i64: 1, 512>}, {pipeline_mode = #tpu.pipeline_mode<synchronous>, transform_indices = @transform_3, window_bounds = array<i64: 512, 512>}, {pipeline_mode = #tpu.pipeline_mode<synchronous>, transform_indices = @transform_4, window_bounds = array<i64: 1, 512>}, {pipeline_mode = #tpu.pipeline_mode<synchronous>, transform_indices = @transform_5, window_bounds = array<i64: 512, 128>}, {pipeline_mode = #tpu.pipeline_mode<synchronous>, transform_indices = @transform_6, window_bounds = array<i64: 1, 128>}, {transform_indices = @transform_7, window_bounds = array<i64: 1, 8, 128>}]} {
    %c0 = arith.constant 0 : index
    %c0_0 = arith.constant 0 : index
    %c0_1 = arith.constant 0 : index
    %0 = vector.load %arg1[%c0, %c0_0, %c0_1] : memref<1x8x32xf32, #tpu.memory_space<vmem>>, vector<1x8x32xf32>
    %1 = vector.shape_cast %0 : vector<1x8x32xf32> to vector<8x32xf32>
    %2 = arith.truncf %1 : vector<8x32xf32> to vector<8x32xbf16>
    %c0_2 = arith.constant 0 : index
    %c0_3 = arith.constant 0 : index
    %3 = vector.load %arg2[%c0_2, %c0_3] : memref<32x512xbf16, #tpu.memory_space<vmem>>, vector<32x512xbf16>
    %cst = arith.constant dense<0.000000e+00> : vector<8x512xf32>
    %4 = tpu.matmul %2, %3, %cst {dimension_numbers = #tpu.dot_dimension_numbers<[1], [0], [0], [1], [0, 0, 1, 1], [], []>} : vector<8x32xbf16>, vector<32x512xbf16>, vector<8x512xf32> -> vector<8x512xf32>
    %c0_4 = arith.constant 0 : index
    %c0_5 = arith.constant 0 : index
    %5 = vector.load %arg3[%c0_4, %c0_5] : memref<1x512xf32, #tpu.memory_space<vmem>>, vector<1x512xf32>
    %6 = vector.broadcast %5 : vector<1x512xf32> to vector<8x512xf32>
    %7 = arith.addf %4, %6 : vector<8x512xf32>
    %cst_6 = arith.constant 0.000000e+00 : f32
    %8 = vector.broadcast %cst_6 : f32 to vector<8x512xf32>
    %9 = arith.maximumf %7, %8 : vector<8x512xf32>
    %10 = arith.truncf %9 : vector<8x512xf32> to vector<8x512xbf16>
    %c0_7 = arith.constant 0 : index
    %c0_8 = arith.constant 0 : index
    %11 = vector.load %arg4[%c0_7, %c0_8] : memref<512x512xbf16, #tpu.memory_space<vmem>>, vector<512x512xbf16>
    %cst_9 = arith.constant dense<0.000000e+00> : vector<8x512xf32>
    %12 = tpu.matmul %10, %11, %cst_9 {dimension_numbers = #tpu.dot_dimension_numbers<[1], [0], [0], [1], [0, 0, 1, 1], [], []>} : vector<8x512xbf16>, vector<512x512xbf16>, vector<8x512xf32> -> vector<8x512xf32>
    %c0_10 = arith.constant 0 : index
    %c0_11 = arith.constant 0 : index
    %13 = vector.load %arg5[%c0_10, %c0_11] : memref<1x512xf32, #tpu.memory_space<vmem>>, vector<1x512xf32>
    %14 = vector.broadcast %13 : vector<1x512xf32> to vector<8x512xf32>
    %15 = arith.addf %12, %14 : vector<8x512xf32>
    %cst_12 = arith.constant 0.000000e+00 : f32
    %16 = vector.broadcast %cst_12 : f32 to vector<8x512xf32>
    %17 = arith.maximumf %15, %16 : vector<8x512xf32>
    %18 = arith.truncf %17 : vector<8x512xf32> to vector<8x512xbf16>
    %c0_13 = arith.constant 0 : index
    %c0_14 = arith.constant 0 : index
    %19 = vector.load %arg6[%c0_13, %c0_14] : memref<512x128xbf16, #tpu.memory_space<vmem>>, vector<512x128xbf16>
    %cst_15 = arith.constant dense<0.000000e+00> : vector<8x128xf32>
    %20 = tpu.matmul %18, %19, %cst_15 {dimension_numbers = #tpu.dot_dimension_numbers<[1], [0], [0], [1], [0, 0, 1, 1], [], []>} : vector<8x512xbf16>, vector<512x128xbf16>, vector<8x128xf32> -> vector<8x128xf32>
    %c0_16 = arith.constant 0 : index
    %c0_17 = arith.constant 0 : index
    %21 = vector.load %arg7[%c0_16, %c0_17] : memref<1x128xf32, #tpu.memory_space<vmem>>, vector<1x128xf32>
    %22 = vector.broadcast %21 : vector<1x128xf32> to vector<8x128xf32>
    %23 = arith.addf %20, %22 : vector<8x128xf32>
    %c0_18 = arith.constant 0 : index
    %c0_19 = arith.constant 0 : index
    %c0_20 = arith.constant 0 : index
    %24 = vector.load %arg8[%c0_18, %c0_19, %c0_20] : memref<1x8x128xf32, #tpu.memory_space<vmem>>, vector<1x8x128xf32>
    %25 = vector.shape_cast %24 : vector<1x8x128xf32> to vector<8x128xf32>
    %26 = vector.shape_cast %23 : vector<8x128xf32> to vector<1x8x128xf32>
    tpu.vector_store %arg8[%c0_18, %c0_19, %c0_20], %26 {strides = array<i32>} : memref<1x8x128xf32, #tpu.memory_space<vmem>>, vector<1x8x128xf32>,
    return
  }
  func.func @transform_0(%arg0: i32) -> (i32, i32, i32) {
    %c0_i32 = arith.constant 0 : i32
    %c0_i32_0 = arith.constant 0 : i32
    %c0_i32_1 = arith.constant 0 : i32
    return %arg0, %c0_i32, %c0_i32_0 : i32, i32, i32
  }
  func.func @transform_1(%arg0: i32) -> (i32, i32) {
    %c0_i32 = arith.constant 0 : i32
    %c0_i32_0 = arith.constant 0 : i32
    %c0_i32_1 = arith.constant 0 : i32
    return %c0_i32, %c0_i32_0 : i32, i32
  }
  func.func @transform_2(%arg0: i32) -> (i32, i32) {
    %c0_i32 = arith.constant 0 : i32
    %c0_i32_0 = arith.constant 0 : i32
    %c0_i32_1 = arith.constant 0 : i32
    return %c0_i32, %c0_i32_0 : i32, i32
  }
  func.func @transform_3(%arg0: i32) -> (i32, i32) {
    %c0_i32 = arith.constant 0 : i32
    %c0_i32_0 = arith.constant 0 : i32
    %c0_i32_1 = arith.constant 0 : i32
    return %c0_i32, %c0_i32_0 : i32, i32
  }
  func.func @transform_4(%arg0: i32) -> (i32, i32) {
    %c0_i32 = arith.constant 0 : i32
    %c0_i32_0 = arith.constant 0 : i32
    %c0_i32_1 = arith.constant 0 : i32
    return %c0_i32, %c0_i32_0 : i32, i32
  }
  func.func @transform_5(%arg0: i32) -> (i32, i32) {
    %c0_i32 = arith.constant 0 : i32
    %c0_i32_0 = arith.constant 0 : i32
    %c0_i32_1 = arith.constant 0 : i32
    return %c0_i32, %c0_i32_0 : i32, i32
  }
  func.func @transform_6(%arg0: i32) -> (i32, i32) {
    %c0_i32 = arith.constant 0 : i32
    %c0_i32_0 = arith.constant 0 : i32
    %c0_i32_1 = arith.constant 0 : i32
    return %c0_i32, %c0_i32_0 : i32, i32
  }
  func.func @transform_7(%arg0: i32) -> (i32, i32, i32) {
    %c0_i32 = arith.constant 0 : i32
    %c0_i32_0 = arith.constant 0 : i32
    %c0_i32_1 = arith.constant 0 : i32
    return %arg0, %c0_i32, %c0_i32_0 : i32, i32, i32
  }
}

</mosaic_0001>

<bundles_post_ra>
// kernel: tpu_custom_call.1
= control target key start
LH: loop header
LB: loop body
LE: loop exit
PB: predicated region body
PF: predicated region fallthrough
CT: control target
= control target key end

     0   :  { %12 = vsyncpa [#allocation3], 0  ;;  %s2710_s0 = inlined_call_operand.hbm [shape: f32[1,8,32], index: 0, kind: input, shape index: {}]   ;;  %s2711_s1 = inlined_call_operand.hbm [shape: bf16[32,512], index: 1, kind: input, shape index: {}]   ;;  %s2712_s2 = inlined_call_operand.hbm [shape: f32[1,512], index: 2, kind: input, shape index: {}]   ;;  %s2713_s3 = inlined_call_operand.hbm [shape: bf16[512,512], index: 3, kind: input, shape index: {}]   ;;  %s2714_s4 = inlined_call_operand.hbm [shape: f32[1,512], index: 4, kind: input, shape index: {}]   ;;  %s2715_s5 = inlined_call_operand.hbm [shape: bf16[512,128], index: 5, kind: input, shape index: {}]   ;;  %s2716_s6 = inlined_call_operand.vmem [shape: f32[1,128], index: 6, kind: input, shape index: {}]   ;;  %s2717_s7 = inlined_call_operand.hbm [shape: f32[1,8,128], index: 7, kind: output, shape index: {}]  }
   0x1   :  { %13 = vsyncpa [#allocation6], 0 }
   0x2   :  { %14 = vsyncpa [#allocation9], 0 }
   0x3   :  { %15 = vsyncpa [#allocation12], 0  ;;  %s32_s26 = sshll.u32 %s2711_s1, 4  ;;  %s33_s26 = int_to_ptr.hbm [resolvable:$true] %s32_s26 }
   0x4   :  { %16 = vsyncpa [#allocation4], 0  ;;  %s2601_s27 = smov [#allocation5]   ;;  %s56_s8 = sshll.u32 %s2713_s3, 4  ;;  %s57_s8 = int_to_ptr.hbm [resolvable:$true] %s56_s8 }
   0x5   :  { %s34_s28 = sshll.u32 %s2601_s27, 4  ;;  %s2602_s9 = smov 256   ;;  %s35_s28 = int_to_ptr.vmem [resolvable:$true] %s34_s28 }
   0x6   :  { %s2603_s10 = smov 16   ;;  %s2604_s11 = smov [#allocation8]  }
   0x7   :  { %40 = dma.hbm_to_vmem [thread:$0]  %s33_s26, 1024, %s35_s28, [#allocation6], %s2602_s9, %s2602_s9, %s2603_s10  }
   0x8   :  { %s58_s12 = sshll.u32 %s2604_s11, 4  ;;  %s22_s15 = sshll.u32 %s2710_s0, 4  ;;  %s59_s12 = int_to_ptr.vmem [resolvable:$true] %s58_s12  ;;  %s23_s15 = int_to_ptr.hbm [resolvable:$true] %s22_s15 }
   0x9   :  { %64 = dma.hbm_to_vmem [thread:$0]  %s57_s8, 16384, %s59_s12, [#allocation9], %s2602_s9, %s2602_s9, %s2603_s10  }
   0xa   :  { %s46_s17 = sshll.u32 %s2712_s2, 4  ;;  %s2605_s18 = smov [#allocation2]   ;;  %s47_s17 = int_to_ptr.hbm [resolvable:$true] %s46_s17 }
   0xb   :  { %s24_s19 = sshll.u32 %s2605_s18, 4  ;;  %s2606_s3 = smov [#allocation7]   ;;  %s25_s19 = int_to_ptr.vmem [resolvable:$true] %s24_s19 }
   0xc   :  { %27 = dma.hbm_to_vmem [thread:$0]  %s23_s15, 128, %s25_s19, [#allocation3]  }
   0xd   :  { %s48_s20 = sshll.u32 %s2606_s3, 4  ;;  %s70_s23 = sshll.u32 %s2714_s4, 4  ;;  %s49_s20 = int_to_ptr.vmem [resolvable:$true] %s48_s20  ;;  %s71_s23 = int_to_ptr.hbm [resolvable:$true] %s70_s23 }
   0xe   :  { %51 = dma.hbm_to_vmem [thread:$0]  %s47_s17, 64, %s49_s20, [#allocation6]  }
   0xf   :  { %s80_s25 = sshll.u32 %s2715_s5, 4  ;;  %s2607_s26 = smov [#allocation10]   ;;  %s81_s25 = int_to_ptr.hbm [resolvable:$true] %s80_s25 }
  0x10   :  { %s72_s2 = sshll.u32 %s2607_s26, 4  ;;  %s2608_s27 = smov [#allocation11]   ;;  %s73_s2 = int_to_ptr.vmem [resolvable:$true] %s72_s2 }
  0x11   :  { %75 = dma.hbm_to_vmem [thread:$0]  %s71_s23, 64, %s73_s2, [#allocation9]  }
  0x12   :  { %s82_s28 = sshll.u32 %s2608_s27, 4  ;;  %s2609_s29 = smov 64   ;;  %s83_s28 = int_to_ptr.vmem [resolvable:$true] %s82_s28 }
  0x13   :  { %s2610_s30 = smov 4  }
  0x14   :  { %88 = dma.hbm_to_vmem [thread:$0]  %s81_s25, 4096, %s83_s28, [#allocation12], %s2609_s29, %s2609_s29, %s2610_s30  }
  0x15   :  { %2591 = dma.done.wait [#allocation3], 128  }
  0x16   :  { %2592 = vsyncadd [#allocation3], 4294967168 }
  0x17   :  { %2593 = dma.done.wait [#allocation6], 1088  }
  0x18   :  { %2594 = vsyncadd [#allocation6], 4294966208 }
  0x19   :  { %2595 = dma.done.wait [#allocation9], 16448  }
  0x1a   :  { %2596 = vsyncadd [#allocation9], 4294950848 }
  0x1b   :  { %2597 = dma.done.wait [#allocation12], 4096  }
  0x1c   :  { %2598 = vsyncadd [#allocation12], 4294963200  ;;  %v1585_v0 = vld [vmem:[#allocation5 + $0x20] sm:$0xf]  ;;  %v2249_v1 = vld [vmem:[#allocation5 + $0x2c] sm:$0xf0] }
  0x1d   :  { %v2247_v2 = vld [vmem:[#allocation5 + $0x24] sm:$0xf]  ;;  %v1586_v3 = vor.u32 %v2249_v1, %v1585_v0  ;;  %v1587_v4 = vld [vmem:[#allocation5 + $0x30] sm:$0xf0]  ;;  %v1593_v5 = vld [vmem:[#allocation5 + $0x28] sm:$0xf] }
  0x1e   :  { %v2250_v6 = vld [vmem:[#allocation5 + $0x34] sm:$0xf0]  ;;  %v1590_v7 = vor.u32 %v2247_v2, %v1587_v4  ;;  %v2248_v9 = vld [vmem:[#allocation5 + $0x2c] sm:$0xf]  ;;  %v1595_v10 = vld [vmem:[#allocation5 + $0x38] sm:$0xf0] }
  0x1f   :  { %v1594_v8 = vor.u32 %v2250_v6, %v1593_v5  ;;  %v1569_v11 = vld [vmem:[#allocation5] sm:$0xf]  ;;  %186 = vmatpush.bf16.msra.mxu0 %v1586_v3  ;;  %v1598_v12 = vor.u32 %v2248_v9, %v1595_v10  ;;  %v2245_v13 = vld [vmem:[#allocation5 + $0xc] sm:$0xf0]  ;;  %v2243_v14 = vld [vmem:[#allocation5 + $0x4] sm:$0xf] }
  0x20   :  { %v1571_v15 = vld [vmem:[#allocation5 + $0x10] sm:$0xf0]  ;;  %199 = vmatpush.bf16.msra.mxu1 %v1590_v7  ;;  %v1570_v16 = vor.u32 %v2245_v13, %v1569_v11  ;;  %v1577_v18 = vld [vmem:[#allocation5 + $0x8] sm:$0xf]  ;;  %v2246_v19 = vld [vmem:[#allocation5 + $0x14] sm:$0xf0] }
  0x21   :  { %212 = vmatpush.bf16.msra.mxu2 %v1594_v8  ;;  %v1574_v17 = vor.u32 %v2243_v14, %v1571_v15  ;;  %v2244_v20 = vld [vmem:[#allocation5 + $0xc] sm:$0xf]  ;;  %225 = vmatpush.bf16.msra.mxu3 %v1598_v12  ;;  %v1578_v21 = vor.u32 %v2246_v19, %v1577_v18  ;;  %v1579_v22 = vld [vmem:[#allocation5 + $0x18] sm:$0xf0]  ;;  %vm176_vm0 = vcmask 261120   ;;  %s2611_s8 = smov [#allocation13]  }
  0x22   :  { %v116_v23 = vld [vmem:[#allocation2] sm:$0xff]  ;;  %v1717_v24 = vld [vmem:[#allocation8 + $0xe0] sm:$0xf]  ;;  %v1582_v25 = vor.u32 %v2244_v20, %v1579_v22  ;;  %v2281_v27 = vld [vmem:[#allocation8 + $0xec] sm:$0xf0]  ;;  %s1552_s9 = sshll.u32 %s2611_s8, 4  ;;  %s1553_s9 = int_to_ptr.vmem [resolvable:$true] %s1552_s9 }
  0x23   :  { %v117_v26 = vpack.c.bf16 %v116_v23, %v116_v23  ;;  %v1845_v28 = vld [vmem:[#allocation8 + $0x1e0] sm:$0xf]  ;;  %v2313_v29 = vld [vmem:[#allocation8 + $0x1ec] sm:$0xf0]  ;;  %187 = vmatpush.bf16.msra.mxu0 %v1570_v16  ;;  %v1718_v30 = vor.u32 %v2281_v27, %v1717_v24  ;;  %s1554_s12 = sshll.u32 %s2717_s7, 4  ;;  %s1555_s12 = int_to_ptr.hbm [resolvable:$true] %s1554_s12 }
  0x24   :  { %v1846_v31 = vor.u32 %v2313_v29, %v1845_v28  ;;  %v1701_v32 = vld [vmem:[#allocation8 + $0xc0] sm:$0xf]  ;;  %v2277_v33 = vld [vmem:[#allocation8 + $0xcc] sm:$0xf0]  ;;  %200 = vmatpush.bf16.msra.mxu1 %v1574_v17 }
  0x25   :  { %v1829_v34 = vld [vmem:[#allocation8 + $0x1c0] sm:$0xf]  ;;  %213 = vmatpush.bf16.msra.mxu2 %v1578_v21  ;;  %v2309_v35 = vld [vmem:[#allocation8 + $0x1cc] sm:$0xf0]  ;;  %226 = vmatpush.bf16.msra.mxu3 %v1582_v25  ;;  %v1702_v38 = vor.u32 %v2277_v33, %v1701_v32 }
  0x26   :  { %v1973_v36 = vld [vmem:[#allocation8 + $0x2e0] sm:$0xf]  ;;  %v2345_v37 = vld [vmem:[#allocation8 + $0x2ec] sm:$0xf0]  ;;  %1599 = vmatmul.msk.bf16.vlgmr.msra.gmra.mxu0 %vm176_vm0, %v117_v26  ;;  %v1830_v43 = vor.u32 %v2309_v35, %v1829_v34 }
  0x27   :  { %1018 = vmatpush.bf16.msrb.mxu0 %v1718_v30  ;;  %v1974_v39 = vor.u32 %v2345_v37, %v1973_v36  ;;  %v2101_v40 = vld [vmem:[#allocation8 + $0x3e0] sm:$0xf]  ;;  %v2377_v41 = vld [vmem:[#allocation8 + $0x3ec] sm:$0xf0]  ;;  %1600 = vmatmul.msk.bf16.vlgmr.msra.gmra.mxu1 %vm176_vm0, %v117_v26 }
  0x28   :  { %v1685_v42 = vld [vmem:[#allocation8 + $0xa0] sm:$0xf]  ;;  %1031 = vmatpush.bf16.msrb.mxu1 %v1846_v31  ;;  %v2102_v44 = vor.u32 %v2377_v41, %v2101_v40  ;;  %v2273_v45 = vld [vmem:[#allocation8 + $0xac] sm:$0xf0]  ;;  %1601 = vmatmul.msk.bf16.vlgmr.msra.gmra.mxu2 %vm176_vm0, %v117_v26 }
  0x29   :  { %v1813_v46 = vld [vmem:[#allocation8 + $0x1a0] sm:$0xf]  ;;  %v2305_v47 = vld [vmem:[#allocation8 + $0x1ac] sm:$0xf0]  ;;  %1602 = vmatmul.msk.bf16.vlgmr.msra.gmra.mxu3 %vm176_vm0, %v117_v26  ;;  %1044 = vmatpush.bf16.msrb.mxu2 %v1974_v39  ;;  %v1686_v53 = vor.u32 %v2273_v45, %v1685_v42 }
  0x2a   :  { %v1957_v48 = vld [vmem:[#allocation8 + $0x2c0] sm:$0xf]  ;;  %v2341_v49 = vld [vmem:[#allocation8 + $0x2cc] sm:$0xf0]  ;;  %1057 = vmatpush.bf16.msrb.mxu3 %v2102_v44  ;;  %v1814_v58 = vor.u32 %v2305_v47, %v1813_v46 }
  0x2b   :  { %v2085_v50 = vld [vmem:[#allocation8 + $0x3c0] sm:$0xf]  ;;  %v1958_v51 = vor.u32 %v2341_v49, %v1957_v48  ;;  %v2373_v52 = vld [vmem:[#allocation8 + $0x3cc] sm:$0xf0]  ;;  %1019 = vmatpush.bf16.msrb.mxu0 %v1702_v38  ;;  %v2279_v48 = vld [vmem:[#allocation8 + $0xe4] sm:$0xf] }
  0x2c   :  { %v2086_v54 = vor.u32 %v2373_v52, %v2085_v50  ;;  %v1669_v55 = vld [vmem:[#allocation8 + $0x80] sm:$0xf]  ;;  %v2269_v56 = vld [vmem:[#allocation8 + $0x8c] sm:$0xf0]  ;;  %1032 = vmatpush.bf16.msrb.mxu1 %v1830_v43  ;;  %v1719_v49 = vld [vmem:[#allocation8 + $0xf0] sm:$0xf0] }
  0x2d   :  { %v1941_v57 = vld [vmem:[#allocation8 + $0x2a0] sm:$0xf]  ;;  %v2337_v59 = vld [vmem:[#allocation8 + $0x2ac] sm:$0xf0]  ;;  %1045 = vmatpush.bf16.msrb.mxu2 %v1958_v51  ;;  %v1670_v1 = vor.u32 %v2269_v56, %v1669_v55  ;;  %v2311_v50 = vld [vmem:[#allocation8 + $0x1e4] sm:$0xf] }
  0x2e   :  { %v2069_v60 = vld [vmem:[#allocation8 + $0x3a0] sm:$0xf]  ;;  %v2369_v61 = vld [vmem:[#allocation8 + $0x3ac] sm:$0xf0]  ;;  %v1942_v0 = vor.u32 %v2337_v59, %v1941_v57  ;;  %1058 = vmatpush.bf16.msrb.mxu3 %v2086_v54  ;;  %v1847_v51 = vld [vmem:[#allocation8 + $0x1f0] sm:$0xf0] }
  0x2f   :  { %v1797_v62 = vld [vmem:[#allocation8 + $0x180] sm:$0xf]  ;;  %v2301_v63 = vld [vmem:[#allocation8 + $0x18c] sm:$0xf0]  ;;  %1020 = vmatpush.bf16.msrb.mxu0 %v1686_v53  ;;  %v2070_v2 = vor.u32 %v2369_v61, %v2069_v60  ;;  %v2275_v55 = vld [vmem:[#allocation8 + $0xc4] sm:$0xf]  ;;  %v1722_v60 = vor.u32 %v2279_v48, %v1719_v49 }
  0x30   :  { %v1653_v3 = vld [vmem:[#allocation8 + $0x60] sm:$0xf]  ;;  %v2333_v5 = vld [vmem:[#allocation8 + $0x28c] sm:$0xf0]  ;;  %1033 = vmatpush.bf16.msrb.mxu1 %v1814_v58  ;;  %v1798_v6 = vor.u32 %v2301_v63, %v1797_v62  ;;  %v2343_v62 = vld [vmem:[#allocation8 + $0x2e4] sm:$0xf] }
  0x31   :  { %v1925_v4 = vld [vmem:[#allocation8 + $0x280] sm:$0xf]  ;;  %v2265_v7 = vld [vmem:[#allocation8 + $0x6c] sm:$0xf0]  ;;  %1046 = vmatpush.bf16.msrb.mxu2 %v1942_v0  ;;  %v1975_v63 = vld [vmem:[#allocation8 + $0x2f0] sm:$0xf0]  ;;  %v1850_v0 = vor.u32 %v2311_v50, %v1847_v51 }
  0x32   :  { %v2053_v8 = vld [vmem:[#allocation8 + $0x380] sm:$0xf]  ;;  %v2365_v9 = vld [vmem:[#allocation8 + $0x38c] sm:$0xf0]  ;;  %v1926_v12 = vor.u32 %v2333_v5, %v1925_v4  ;;  %1059 = vmatpush.bf16.msrb.mxu3 %v2070_v2  ;;  %v1654_v13 = vor.u32 %v2265_v7, %v1653_v3  ;;  %v2375_v2 = vld [vmem:[#allocation8 + $0x3e4] sm:$0xf] }
  0x33   :  { %v1781_v10 = vld [vmem:[#allocation8 + $0x160] sm:$0xf]  ;;  %v2297_v11 = vld [vmem:[#allocation8 + $0x16c] sm:$0xf0]  ;;  %1021 = vmatpush.bf16.msrb.mxu0 %v1670_v1  ;;  %v2054_v14 = vor.u32 %v2365_v9, %v2053_v8  ;;  %v1703_v1 = vld [vmem:[#allocation8 + $0xd0] sm:$0xf0]  ;;  %v1978_v8 = vor.u32 %v2343_v62, %v1975_v63 }
  0x34   :  { %v1637_v15 = vld [vmem:[#allocation8 + $0x40] sm:$0xf]  ;;  %v2329_v17 = vld [vmem:[#allocation8 + $0x26c] sm:$0xf0]  ;;  %1034 = vmatpush.bf16.msrb.mxu1 %v1798_v6  ;;  %v1782_v18 = vor.u32 %v2297_v11, %v1781_v10  ;;  %v2103_v3 = vld [vmem:[#allocation8 + $0x3f0] sm:$0xf0]  ;;  %v1706_v9 = vor.u32 %v2275_v55, %v1703_v1 }
  0x35   :  { %v1909_v16 = vld [vmem:[#allocation8 + $0x260] sm:$0xf]  ;;  %v2261_v19 = vld [vmem:[#allocation8 + $0x4c] sm:$0xf0]  ;;  %1047 = vmatpush.bf16.msrb.mxu2 %v1926_v12  ;;  %v2307_v4 = vld [vmem:[#allocation8 + $0x1c4] sm:$0xf]  ;;  %v2106_v10 = vor.u32 %v2375_v2, %v2103_v3 }
  0x36   :  { %v2037_v20 = vld [vmem:[#allocation8 + $0x360] sm:$0xf]  ;;  %v2361_v21 = vld [vmem:[#allocation8 + $0x36c] sm:$0xf0]  ;;  %v1910_v24 = vor.u32 %v2329_v17, %v1909_v16  ;;  %1060 = vmatpush.bf16.msrb.mxu3 %v2054_v14  ;;  %v1638_v25 = vor.u32 %v2261_v19, %v1637_v15  ;;  %v1831_v5 = vld [vmem:[#allocation8 + $0x1d0] sm:$0xf0] }
  0x37   :  { %v1765_v22 = vld [vmem:[#allocation8 + $0x140] sm:$0xf]  ;;  %v2293_v23 = vld [vmem:[#allocation8 + $0x14c] sm:$0xf0]  ;;  %1022 = vmatpush.bf16.msrb.mxu0 %v1654_v13  ;;  %v2038_v26 = vor.u32 %v2361_v21, %v2037_v20  ;;  %v2271_v11 = vld [vmem:[#allocation8 + $0xa4] sm:$0xf]  ;;  %v1834_v14 = vor.u32 %v2307_v4, %v1831_v5 }
  0x38   :  { %v1621_v27 = vld [vmem:[#allocation8 + $0x20] sm:$0xf]  ;;  %v2325_v29 = vld [vmem:[#allocation8 + $0x24c] sm:$0xf0]  ;;  %1035 = vmatpush.bf16.msrb.mxu1 %v1782_v18  ;;  %v1766_v30 = vor.u32 %v2293_v23, %v1765_v22  ;;  %v2339_v12 = vld [vmem:[#allocation8 + $0x2c4] sm:$0xf] }
  0x39   :  { %v1893_v28 = vld [vmem:[#allocation8 + $0x240] sm:$0xf]  ;;  %v2257_v31 = vld [vmem:[#allocation8 + $0x2c] sm:$0xf0]  ;;  %1048 = vmatpush.bf16.msrb.mxu2 %v1910_v24  ;;  %v1959_v13 = vld [vmem:[#allocation8 + $0x2d0] sm:$0xf0] }
  0x3a   :  { %v2021_v32 = vld [vmem:[#allocation8 + $0x340] sm:$0xf]  ;;  %v2357_v33 = vld [vmem:[#allocation8 + $0x34c] sm:$0xf0]  ;;  %v1894_v36 = vor.u32 %v2325_v29, %v1893_v28  ;;  %1061 = vmatpush.bf16.msrb.mxu3 %v2038_v26  ;;  %v1622_v38 = vor.u32 %v2257_v31, %v1621_v27  ;;  %v1687_v15 = vld [vmem:[#allocation8 + $0xb0] sm:$0xf0]  ;;  %v1962_v20 = vor.u32 %v2339_v12, %v1959_v13 }
  0x3b   :  { %v1749_v34 = vld [vmem:[#allocation8 + $0x120] sm:$0xf]  ;;  %v2289_v35 = vld [vmem:[#allocation8 + $0x12c] sm:$0xf0]  ;;  %1023 = vmatpush.bf16.msrb.mxu0 %v1638_v25  ;;  %v2022_v39 = vor.u32 %v2357_v33, %v2021_v32  ;;  %v2371_v16 = vld [vmem:[#allocation8 + $0x3c4] sm:$0xf]  ;;  %v1690_v21 = vor.u32 %v2271_v11, %v1687_v15 }
  0x3c   :  { %v1605_v37 = vld [vmem:[#allocation8] sm:$0xf]  ;;  %v2253_v40 = vld [vmem:[#allocation8 + $0xc] sm:$0xf0]  ;;  %1036 = vmatpush.bf16.msrb.mxu1 %v1766_v30  ;;  %v1750_v43 = vor.u32 %v2289_v35, %v1749_v34  ;;  %v2087_v17 = vld [vmem:[#allocation8 + $0x3d0] sm:$0xf0] }
  0x3d   :  { %v1877_v41 = vld [vmem:[#allocation8 + $0x220] sm:$0xf]  ;;  %v2321_v42 = vld [vmem:[#allocation8 + $0x22c] sm:$0xf0]  ;;  %1049 = vmatpush.bf16.msrb.mxu2 %v1894_v36  ;;  %v1606_v53 = vor.u32 %v2253_v40, %v1605_v37  ;;  %v2303_v18 = vld [vmem:[#allocation8 + $0x1a4] sm:$0xf]  ;;  %v2090_v22 = vor.u32 %v2371_v16, %v2087_v17 }
  0x3e   :  { %v1733_v44 = vld [vmem:[#allocation8 + $0x100] sm:$0xf]  ;;  %v2353_v46 = vld [vmem:[#allocation8 + $0x32c] sm:$0xf0]  ;;  %v1878_v52 = vor.u32 %v2321_v42, %v1877_v41  ;;  %1062 = vmatpush.bf16.msrb.mxu3 %v2022_v39  ;;  %v1815_v19 = vld [vmem:[#allocation8 + $0x1b0] sm:$0xf0] }
  0x3f   :  { %v2005_v45 = vld [vmem:[#allocation8 + $0x320] sm:$0xf]  ;;  %v2285_v47 = vld [vmem:[#allocation8 + $0x10c] sm:$0xf0]  ;;  %1024 = vmatpush.bf16.msrb.mxu0 %v1622_v38  ;;  %v2267_v23 = vld [vmem:[#allocation8 + $0x84] sm:$0xf]  ;;  %v1818_v26 = vor.u32 %v2303_v18, %v1815_v19 }
  0x40   :  { %v2006_v54 = vor.u32 %v2353_v46, %v2005_v45  ;;  %v1861_v56 = vld [vmem:[#allocation8 + $0x200] sm:$0xf]  ;;  %v2317_v57 = vld [vmem:[#allocation8 + $0x20c] sm:$0xf0]  ;;  %1037 = vmatpush.bf16.msrb.mxu1 %v1750_v43  ;;  %v1734_v59 = vor.u32 %v2285_v47, %v1733_v44  ;;  %v2335_v24 = vld [vmem:[#allocation8 + $0x2a4] sm:$0xf] }
  0x41   :  { %v1989_v58 = vld [vmem:[#allocation8 + $0x300] sm:$0xf]  ;;  %v2349_v61 = vld [vmem:[#allocation8 + $0x30c] sm:$0xf0]  ;;  %1050 = vmatpush.bf16.msrb.mxu2 %v1878_v52  ;;  %v1862_v6 = vor.u32 %v2317_v57, %v1861_v56  ;;  %v1943_v25 = vld [vmem:[#allocation8 + $0x2b0] sm:$0xf0] }
  0x42   :  { %1063 = vmatpush.bf16.msrb.mxu3 %v2006_v54  ;;  %v1990_v7 = vor.u32 %v2349_v61, %v1989_v58  ;;  %v1671_v27 = vld [vmem:[#allocation8 + $0x90] sm:$0xf0]  ;;  %v2367_v28 = vld [vmem:[#allocation8 + $0x3a4] sm:$0xf]  ;;  %v1946_v32 = vor.u32 %v2335_v24, %v1943_v25 }
  0x43   :  { %1025 = vmatpush.bf16.msrb.mxu0 %v1606_v53  ;;  %v2071_v29 = vld [vmem:[#allocation8 + $0x3b0] sm:$0xf0]  ;;  %v2299_v30 = vld [vmem:[#allocation8 + $0x184] sm:$0xf]  ;;  %v1674_v33 = vor.u32 %v2267_v23, %v1671_v27 }
  0x44   :  { %1038 = vmatpush.bf16.msrb.mxu1 %v1734_v59  ;;  %v1799_v31 = vld [vmem:[#allocation8 + $0x190] sm:$0xf0]  ;;  %v2074_v34 = vor.u32 %v2367_v28, %v2071_v29  ;;  %v2263_v35 = vld [vmem:[#allocation8 + $0x64] sm:$0xf] }
  0x45   :  { %1051 = vmatpush.bf16.msrb.mxu2 %v1862_v6  ;;  %v2331_v36 = vld [vmem:[#allocation8 + $0x284] sm:$0xf]  ;;  %v1927_v37 = vld [vmem:[#allocation8 + $0x290] sm:$0xf0]  ;;  %v1802_v38 = vor.u32 %v2299_v30, %v1799_v31 }
  0x46   :  { %1064 = vmatpush.bf16.msrb.mxu3 %v1990_v7  ;;  %v1655_v39 = vld [vmem:[#allocation8 + $0x70] sm:$0xf0]  ;;  %v2363_v40 = vld [vmem:[#allocation8 + $0x384] sm:$0xf]  ;;  %v1930_v44 = vor.u32 %v2331_v36, %v1927_v37  ;;  %v2314_v36 = vld [vmem:[#allocation8 + $0x1f4] sm:$0xf0] }
  0x47   :  { %1070 = vmatpush.bf16.msra.mxu0 %v1722_v60  ;;  %v2055_v41 = vld [vmem:[#allocation8 + $0x390] sm:$0xf0]  ;;  %v2295_v42 = vld [vmem:[#allocation8 + $0x164] sm:$0xf]  ;;  %v1658_v45 = vor.u32 %v2263_v35, %v1655_v39  ;;  %v1853_v35 = vld [vmem:[#allocation8 + $0x1e8] sm:$0xf] }
  0x48   :  { %1083 = vmatpush.bf16.msra.mxu1 %v1850_v0  ;;  %v1783_v43 = vld [vmem:[#allocation8 + $0x170] sm:$0xf0]  ;;  %v2058_v46 = vor.u32 %v2363_v40, %v2055_v41  ;;  %v2259_v48 = vld [vmem:[#allocation8 + $0x44] sm:$0xf] }
  0x49   :  { %1096 = vmatpush.bf16.msra.mxu2 %v1978_v8  ;;  %v1786_v47 = vor.u32 %v2295_v42, %v1783_v43  ;;  %v1639_v49 = vld [vmem:[#allocation8 + $0x50] sm:$0xf0]  ;;  %v2291_v50 = vld [vmem:[#allocation8 + $0x144] sm:$0xf]  ;;  %v1854_v43 = vor.u32 %v2314_v36, %v1853_v35 }
  0x4a   :  { %1109 = vmatpush.bf16.msra.mxu3 %v2106_v10  ;;  %v1767_v51 = vld [vmem:[#allocation8 + $0x150] sm:$0xf0]  ;;  %v1642_v52 = vor.u32 %v2259_v48, %v1639_v49  ;;  %v2327_v54 = vld [vmem:[#allocation8 + $0x264] sm:$0xf]  ;;  %v2310_v48 = vld [vmem:[#allocation8 + $0x1d4] sm:$0xf0] }
  0x4b   :  { %1071 = vmatpush.bf16.msra.mxu0 %v1706_v9  ;;  %v1770_v53 = vor.u32 %v2291_v50, %v1767_v51  ;;  %v1911_v55 = vld [vmem:[#allocation8 + $0x270] sm:$0xf0]  ;;  %v2359_v56 = vld [vmem:[#allocation8 + $0x364] sm:$0xf] }
  0x4c   :  { %1084 = vmatpush.bf16.msra.mxu1 %v1834_v14  ;;  %v1914_v57 = vor.u32 %v2327_v54, %v1911_v55  ;;  %v2039_v58 = vld [vmem:[#allocation8 + $0x370] sm:$0xf0]  ;;  %v2255_v60 = vld [vmem:[#allocation8 + $0x24] sm:$0xf]  ;;  %v1981_v54 = vld [vmem:[#allocation8 + $0x2e8] sm:$0xf] }
  0x4d   :  { %1097 = vmatpush.bf16.msra.mxu2 %v1962_v20  ;;  %v2042_v59 = vor.u32 %v2359_v56, %v2039_v58  ;;  %v1623_v61 = vld [vmem:[#allocation8 + $0x30] sm:$0xf0]  ;;  %v2287_v63 = vld [vmem:[#allocation8 + $0x124] sm:$0xf]  ;;  %v2346_v55 = vld [vmem:[#allocation8 + $0x2f4] sm:$0xf0] }
  0x4e   :  { %1110 = vmatpush.bf16.msra.mxu3 %v2090_v22  ;;  %v1626_v62 = vor.u32 %v2255_v60, %v1623_v61  ;;  %v1751_v0 = vld [vmem:[#allocation8 + $0x130] sm:$0xf0]  ;;  %v2323_v2 = vld [vmem:[#allocation8 + $0x244] sm:$0xf]  ;;  %v2109_v56 = vld [vmem:[#allocation8 + $0x3e8] sm:$0xf] }
  0x4f   :  { %1072 = vmatpush.bf16.msra.mxu0 %v1690_v21  ;;  %v1754_v1 = vor.u32 %v2287_v63, %v1751_v0  ;;  %v1895_v3 = vld [vmem:[#allocation8 + $0x250] sm:$0xf0]  ;;  %v2355_v4 = vld [vmem:[#allocation8 + $0x344] sm:$0xf]  ;;  %v2378_v60 = vld [vmem:[#allocation8 + $0x3f4] sm:$0xf0] }
  0x50   :  { %1085 = vmatpush.bf16.msra.mxu1 %v1818_v26  ;;  %v1898_v5 = vor.u32 %v2323_v2, %v1895_v3  ;;  %v2023_v6 = vld [vmem:[#allocation8 + $0x350] sm:$0xf0]  ;;  %v2251_v8 = vld [vmem:[#allocation8 + $0x4] sm:$0xf]  ;;  %v126_v26 = vld [vmem:[#allocation7] sm:$0xf]  ;;  %v1982_v3 = vor.u32 %v2346_v55, %v1981_v54 }
  0x51   :  { %1098 = vmatpush.bf16.msra.mxu2 %v1946_v32  ;;  %v2026_v7 = vor.u32 %v2355_v4, %v2023_v6  ;;  %v1607_v9 = vld [vmem:[#allocation8 + $0x10] sm:$0xf0]  ;;  %v2283_v10 = vld [vmem:[#allocation8 + $0x104] sm:$0xf]  ;;  %v128_v27 = vperm.slane %v126_v26, 0  ;;  %v129_v28 = vperm.slane %v126_v26, 1 }
  0x52   :  { %1111 = vmatpush.bf16.msra.mxu3 %v2074_v34  ;;  %v1610_v11 = vor.u32 %v2251_v8, %v1607_v9  ;;  %v1735_v12 = vld [vmem:[#allocation8 + $0x110] sm:$0xf0]  ;;  %v2319_v14 = vld [vmem:[#allocation8 + $0x224] sm:$0xf]  ;;  %v1725_v32 = vld [vmem:[#allocation8 + $0xe8] sm:$0xf] }
  0x53   :  { %1073 = vmatpush.bf16.msra.mxu0 %v1674_v33  ;;  %v1738_v13 = vor.u32 %v2283_v10, %v1735_v12  ;;  %v1879_v15 = vld [vmem:[#allocation8 + $0x230] sm:$0xf0]  ;;  %v2351_v17 = vld [vmem:[#allocation8 + $0x324] sm:$0xf]  ;;  %v2282_v33 = vld [vmem:[#allocation8 + $0xf4] sm:$0xf0] }
  0x54   :  { %1086 = vmatpush.bf16.msra.mxu1 %v1802_v38  ;;  %v1882_v16 = vor.u32 %v2319_v14, %v1879_v15  ;;  %v2007_v18 = vld [vmem:[#allocation8 + $0x330] sm:$0xf0]  ;;  %v2315_v20 = vld [vmem:[#allocation8 + $0x204] sm:$0xf]  ;;  %v130_v39 = vperm.slane %v126_v26, 2  ;;  %v1726_v40 = vor.u32 %v2282_v33, %v1725_v32  ;;  %v131_v42 = vperm.slane %v126_v26, 3 }
  0x55   :  { %1099 = vmatpush.bf16.msra.mxu2 %v1930_v44  ;;  %v2010_v19 = vor.u32 %v2351_v17, %v2007_v18  ;;  %v1863_v21 = vld [vmem:[#allocation8 + $0x210] sm:$0xf0]  ;;  %v2347_v23 = vld [vmem:[#allocation8 + $0x304] sm:$0xf]  ;;  %v1709_v44 = vld [vmem:[#allocation8 + $0xc8] sm:$0xf] }
  0x56   :  { %1112 = vmatpush.bf16.msra.mxu3 %v2058_v46  ;;  %v1866_v22 = vor.u32 %v2315_v20, %v1863_v21  ;;  %v1991_v24 = vld [vmem:[#allocation8 + $0x310] sm:$0xf0]  ;;  %v1693_v61 = vld [vmem:[#allocation8 + $0xa8] sm:$0xf]  ;;  %v2342_v8 = vld [vmem:[#allocation8 + $0x2d4] sm:$0xf0] }
  0x57   :  { %1074 = vmatpush.bf16.msra.mxu0 %v1658_v45  ;;  %v1994_v25 = vor.u32 %v2347_v23, %v1991_v24  ;;  %v2278_v45 = vld [vmem:[#allocation8 + $0xd4] sm:$0xf0]  ;;  %v1821_v0 = vld [vmem:[#allocation8 + $0x1a8] sm:$0xf] }
  0x58   :  { %1087 = vmatpush.bf16.msra.mxu1 %v1786_v47  ;;  %v1837_v47 = vld [vmem:[#allocation8 + $0x1c8] sm:$0xf]  ;;  %v2374_v12 = vld [vmem:[#allocation8 + $0x3d4] sm:$0xf0] }
  0x59   :  { %1100 = vmatpush.bf16.msra.mxu2 %v1914_v57  ;;  %v2093_v9 = vld [vmem:[#allocation8 + $0x3c8] sm:$0xf]  ;;  %v2270_v14 = vld [vmem:[#allocation8 + $0x94] sm:$0xf0] }
  0x5a   :  { %1113 = vmatpush.bf16.msra.mxu3 %v2042_v59  ;;  %v1838_v59 = vor.u32 %v2310_v48, %v1837_v47  ;;  %v1805_v15 = vld [vmem:[#allocation8 + $0x188] sm:$0xf]  ;;  %v2094_v20 = vor.u32 %v2374_v12, %v2093_v9  ;;  %v2338_v23 = vld [vmem:[#allocation8 + $0x2b4] sm:$0xf0]  ;;  %v2312_v9 = vld [vmem:[#allocation8 + $0x1ec] sm:$0xf] }
  0x5b   :  { %1075 = vmatpush.bf16.msra.mxu0 %v1642_v52  ;;  %v2370_v26 = vld [vmem:[#allocation8 + $0x3b4] sm:$0xf0]  ;;  %v1933_v33 = vld [vmem:[#allocation8 + $0x288] sm:$0xf] }
  0x5c   :  { %1088 = vmatpush.bf16.msra.mxu1 %v1770_v53  ;;  %v1710_v53 = vor.u32 %v2278_v45, %v1709_v44  ;;  %v1917_v47 = vld [vmem:[#allocation8 + $0x268] sm:$0xf]  ;;  %v2330_v48 = vld [vmem:[#allocation8 + $0x274] sm:$0xf0] }
  0x5d   :  { %1101 = vmatpush.bf16.msra.mxu2 %v1898_v5  ;;  %v2110_v5 = vor.u32 %v2378_v60, %v2109_v56  ;;  %v2258_v54 = vld [vmem:[#allocation8 + $0x34] sm:$0xf0]  ;;  %v1757_v55 = vld [vmem:[#allocation8 + $0x128] sm:$0xf] }
  0x5e   :  { %1114 = vmatpush.bf16.msra.mxu3 %v2026_v7  ;;  %v1965_v7 = vld [vmem:[#allocation8 + $0x2c8] sm:$0xf]  ;;  %v2290_v56 = vld [vmem:[#allocation8 + $0x134] sm:$0xf0] }
  0x5f   :  { %1076 = vmatpush.bf16.msra.mxu0 %v1626_v62  ;;  %v2274_v62 = vld [vmem:[#allocation8 + $0xb4] sm:$0xf0]  ;;  %v1966_v18 = vor.u32 %v2342_v8, %v1965_v7  ;;  %v1727_v8 = vld [vmem:[#allocation8 + $0xf8] sm:$0xf0] }
  0x60   :  { %1089 = vmatpush.bf16.msra.mxu1 %v1754_v1  ;;  %v2306_v1 = vld [vmem:[#allocation8 + $0x1b4] sm:$0xf0]  ;;  %v1694_v6 = vor.u32 %v2274_v62, %v1693_v61  ;;  %v2029_v61 = vld [vmem:[#allocation8 + $0x348] sm:$0xf] }
  0x61   :  { %1102 = vmatpush.bf16.msra.mxu2 %v1882_v16  ;;  %v2302_v16 = vld [vmem:[#allocation8 + $0x194] sm:$0xf0] }
  0x62   :  { %1115 = vmatpush.bf16.msra.mxu3 %v2010_v19  ;;  %v1806_v24 = vor.u32 %v2302_v16, %v1805_v15  ;;  %v2326_v60 = vld [vmem:[#allocation8 + $0x254] sm:$0xf0] }
  0x63   :  { %1077 = vmatpush.bf16.msra.mxu0 %v1610_v11  ;;  %v1822_v11 = vor.u32 %v2306_v1, %v1821_v0  ;;  %v2358_v0 = vld [vmem:[#allocation8 + $0x354] sm:$0xf0]  ;;  %v1613_v1 = vld [vmem:[#allocation8 + $0x8] sm:$0xf] }
  0x64   :  { %1090 = vmatpush.bf16.msra.mxu1 %v1738_v13  ;;  %v1677_v13 = vld [vmem:[#allocation8 + $0x88] sm:$0xf]  ;;  %v2030_v12 = vor.u32 %v2358_v0, %v2029_v61  ;;  %v2079_v0 = vld [vmem:[#allocation8 + $0x3b8] sm:$0xf0] }
  0x65   :  { %1103 = vmatpush.bf16.msra.mxu2 %v1866_v22  ;;  %v1678_v21 = vor.u32 %v2270_v14, %v1677_v13  ;;  %v1949_v22 = vld [vmem:[#allocation8 + $0x2a8] sm:$0xf]  ;;  %v2322_v14 = vld [vmem:[#allocation8 + $0x234] sm:$0xf0] }
  0x66   :  { %1116 = vmatpush.bf16.msra.mxu3 %v1994_v25  ;;  %v2077_v25 = vld [vmem:[#allocation8 + $0x3a8] sm:$0xf] }
  0x67   :  { %v2078_v32 = vor.u32 %v2370_v26, %v2077_v25  ;;  %v1885_v13 = vld [vmem:[#allocation8 + $0x228] sm:$0xf]  ;;  %v1839_v25 = vld [vmem:[#allocation8 + $0x1d8] sm:$0xf0] }
  0xa3   :  { %v189_v29 = vpop.f32.mrf.mxu0 }
  0xa4   :  { %v190_v30 = vadd.f32 %v189_v29, %v128_v27  ;;  %v202_v31 = vpop.f32.mrf.mxu1  ;;  %v1661_v27 = vld [vmem:[#allocation8 + $0x68] sm:$0xf] }
  0xa5   :  { %v203_v34 = vadd.f32 %v202_v31, %v129_v28  ;;  %v2266_v28 = vld [vmem:[#allocation8 + $0x74] sm:$0xf0]  ;;  %v1789_v29 = vld [vmem:[#allocation8 + $0x168] sm:$0xf]  ;;  %v1950_v31 = vor.u32 %v2338_v23, %v1949_v22  ;;  %v1886_v22 = vor.u32 %v2322_v14, %v1885_v13  ;;  %v1711_v23 = vld [vmem:[#allocation8 + $0xd8] sm:$0xf0] }
  0xa6   :  { %v232_v37 = vmax.f32 %v190_v30, 0.0  ;;  %v2298_v30 = vld [vmem:[#allocation8 + $0x174] sm:$0xf0]  ;;  %v1662_v35 = vor.u32 %v2266_v28, %v1661_v27  ;;  %v1869_v27 = vld [vmem:[#allocation8 + $0x208] sm:$0xf] }
  0xa7   :  { %v233_v38 = vmax.f32 %v203_v34, 0.0  ;;  %v2334_v34 = vld [vmem:[#allocation8 + $0x294] sm:$0xf0]  ;;  %v1790_v36 = vor.u32 %v2298_v30, %v1789_v29  ;;  %v1997_v29 = vld [vmem:[#allocation8 + $0x308] sm:$0xf] }
  0xa8   :  { %v2674_v41 = vpack.c.bf16 %v232_v37, %v232_v37  ;;  %v2061_v37 = vld [vmem:[#allocation8 + $0x388] sm:$0xf]  ;;  %v1934_v44 = vor.u32 %v2334_v34, %v1933_v33  ;;  %v2318_v28 = vld [vmem:[#allocation8 + $0x214] sm:$0xf0]  ;;  %v2364_v13 = vld [vmem:[#allocation8 + $0x38c] sm:$0xf] }
  0xa9   :  { %v2676_v46 = vpack.c.bf16 %v233_v38, %v233_v38  ;;  %v2366_v38 = vld [vmem:[#allocation8 + $0x394] sm:$0xf0]  ;;  %v2063_v14 = vld [vmem:[#allocation8 + $0x398] sm:$0xf0] }
  0xaa   :  { %1026 = vmatmul.bf16.vlgmr.msrb.gmra.mxu0 %v2674_v41  ;;  %v2062_v45 = vor.u32 %v2366_v38, %v2061_v37  ;;  %v2350_v30 = vld [vmem:[#allocation8 + $0x314] sm:$0xf0]  ;;  %v2272_v37 = vld [vmem:[#allocation8 + $0xac] sm:$0xf]  ;;  %v1870_v38 = vor.u32 %v2318_v28, %v1869_v27  ;;  %v1631_v28 = vld [vmem:[#allocation8 + $0x38] sm:$0xf0] }
  0xab   :  { %v215_v49 = vpop.f32.mrf.mxu2  ;;  %1039 = vmatmul.bf16.vlgmr.msrb.gmra.mxu1 %v2676_v46  ;;  %1122 = vmatpush.bf16.msrb.mxu0 %v1726_v40  ;;  %v191_v52 = vpop.f32.mrf.mxu0  ;;  %v2262_v40 = vld [vmem:[#allocation8 + $0x54] sm:$0xf0]  ;;  %v2256_v27 = vld [vmem:[#allocation8 + $0x2c] sm:$0xf] }
  0xac   :  { %v216_v50 = vadd.f32 %v215_v49, %v130_v39  ;;  %v228_v51 = vpop.f32.mrf.mxu3  ;;  %1135 = vmatpush.bf16.msrb.mxu1 %v1854_v43  ;;  %v204_v58 = vpop.f32.mrf.mxu1  ;;  %v1645_v39 = vld [vmem:[#allocation8 + $0x48] sm:$0xf]  ;;  %v2294_v43 = vld [vmem:[#allocation8 + $0x154] sm:$0xf0] }
  0xad   :  { %v229_v57 = vadd.f32 %v228_v51, %v131_v42  ;;  %v1773_v42 = vld [vmem:[#allocation8 + $0x148] sm:$0xf]  ;;  %v1646_v49 = vor.u32 %v2262_v40, %v1645_v39  ;;  %v2362_v52 = vld [vmem:[#allocation8 + $0x374] sm:$0xf0]  ;;  %v1695_v39 = vld [vmem:[#allocation8 + $0xb8] sm:$0xf0] }
  0xae   :  { %v234_v63 = vmax.f32 %v216_v50, 0.0  ;;  %v1774_v50 = vor.u32 %v2294_v43, %v1773_v42  ;;  %v2045_v51 = vld [vmem:[#allocation8 + $0x368] sm:$0xf]  ;;  %v2304_v40 = vld [vmem:[#allocation8 + $0x1ac] sm:$0xf]  ;;  %v1998_v43 = vor.u32 %v2350_v30, %v1997_v29 }
  0xaf   :  { %v235_v2 = vmax.f32 %v229_v57, 0.0  ;;  %1123 = vmatpush.bf16.msrb.mxu0 %v1710_v53  ;;  %v1629_v53 = vld [vmem:[#allocation8 + $0x28] sm:$0xf]  ;;  %v1918_v57 = vor.u32 %v2330_v48, %v1917_v47  ;;  %v2046_v58 = vor.u32 %v2362_v52, %v2045_v51  ;;  %v1823_v42 = vld [vmem:[#allocation8 + $0x1b8] sm:$0xf0] }
  0xb0   :  { %v2680_v4 = vpack.c.bf16 %v234_v63, %v234_v63  ;;  %1136 = vmatpush.bf16.msrb.mxu1 %v1838_v59  ;;  %v1901_v59 = vld [vmem:[#allocation8 + $0x248] sm:$0xf]  ;;  %v1630_v62 = vor.u32 %v2258_v54, %v1629_v53  ;;  %v1758_v63 = vor.u32 %v2290_v56, %v1757_v55  ;;  %v2340_v47 = vld [vmem:[#allocation8 + $0x2cc] sm:$0xf]  ;;  %v1967_v48 = vld [vmem:[#allocation8 + $0x2d8] sm:$0xf0] }
  0xb1   :  { %v2682_v10 = vpack.c.bf16 %v235_v2, %v235_v2  ;;  %v2254_v2 = vld [vmem:[#allocation8 + $0x14] sm:$0xf0]  ;;  %v1902_v7 = vor.u32 %v2326_v60, %v1901_v59  ;;  %v2372_v51 = vld [vmem:[#allocation8 + $0x3cc] sm:$0xf]  ;;  %v2095_v52 = vld [vmem:[#allocation8 + $0x3d8] sm:$0xf0] }
  0xb2   :  { %1052 = vmatmul.bf16.vlgmr.msrb.gmra.mxu2 %v2680_v4  ;;  %v1614_v15 = vor.u32 %v2254_v2, %v1613_v1  ;;  %v2268_v53 = vld [vmem:[#allocation8 + $0x8c] sm:$0xf]  ;;  %v1679_v54 = vld [vmem:[#allocation8 + $0x98] sm:$0xf0] }
  0xb3   :  { %1065 = vmatmul.bf16.vlgmr.msrb.gmra.mxu3 %v2682_v10  ;;  %1148 = vmatpush.bf16.msrb.mxu2 %v1982_v3  ;;  %v217_v17 = vpop.f32.mrf.mxu2  ;;  %v1741_v3 = vld [vmem:[#allocation8 + $0x108] sm:$0xf]  ;;  %v2300_v55 = vld [vmem:[#allocation8 + $0x18c] sm:$0xf]  ;;  %v1807_v56 = vld [vmem:[#allocation8 + $0x198] sm:$0xf0]  ;;  %v1682_v61 = vor.u32 %v2268_v53, %v1679_v54 }
  0xb4   :  { %1161 = vmatpush.bf16.msrb.mxu3 %v2110_v5  ;;  %v230_v19 = vpop.f32.mrf.mxu3  ;;  %1124 = vmatpush.bf16.msrb.mxu0 %v1694_v6  ;;  %v2286_v5 = vld [vmem:[#allocation8 + $0x114] sm:$0xf0]  ;;  %v2280_v6 = vld [vmem:[#allocation8 + $0xec] sm:$0xf]  ;;  %v2013_v17 = vld [vmem:[#allocation8 + $0x328] sm:$0xf] }
  0xb5   :  { %1137 = vmatpush.bf16.msrb.mxu1 %v1822_v11  ;;  %v1855_v11 = vld [vmem:[#allocation8 + $0x1f8] sm:$0xf0]  ;;  %v1742_v16 = vor.u32 %v2286_v5, %v1741_v3  ;;  %v1730_v19 = vor.u32 %v2280_v6, %v1727_v8  ;;  %v2336_v59 = vld [vmem:[#allocation8 + $0x2ac] sm:$0xf] }
  0xb6   :  { %v1951_v60 = vld [vmem:[#allocation8 + $0x2b8] sm:$0xf0]  ;;  %v2264_v1 = vld [vmem:[#allocation8 + $0x6c] sm:$0xf] }
  0xb7   :  { %1149 = vmatpush.bf16.msrb.mxu2 %v1966_v18  ;;  %v2354_v18 = vld [vmem:[#allocation8 + $0x334] sm:$0xf0]  ;;  %v1663_v2 = vld [vmem:[#allocation8 + $0x78] sm:$0xf0]  ;;  %v2296_v3 = vld [vmem:[#allocation8 + $0x16c] sm:$0xf]  ;;  %v1954_v6 = vor.u32 %v2336_v59, %v1951_v60 }
  0xb8   :  { %1162 = vmatpush.bf16.msrb.mxu3 %v2094_v20  ;;  %1125 = vmatpush.bf16.msrb.mxu0 %v1678_v21  ;;  %v1858_v20 = vor.u32 %v2312_v9, %v1855_v11  ;;  %v2276_v21 = vld [vmem:[#allocation8 + $0xcc] sm:$0xf]  ;;  %v2014_v26 = vor.u32 %v2354_v18, %v2013_v17  ;;  %v1791_v5 = vld [vmem:[#allocation8 + $0x178] sm:$0xf0]  ;;  %v1666_v11 = vor.u32 %v2264_v1, %v1663_v2  ;;  %v2385_v60 = vld [vmem:[#allocation11 + $0x30] sm:$0xff] }
  0xb9   :  { %1138 = vmatpush.bf16.msrb.mxu1 %v1806_v24  ;;  %v2308_v24 = vld [vmem:[#allocation8 + $0x1cc] sm:$0xf]  ;;  %v1714_v33 = vor.u32 %v2276_v21, %v1711_v23  ;;  %v1935_v9 = vld [vmem:[#allocation8 + $0x298] sm:$0xf0] }
  0xba   :  { %1078 = vmatmul.bf16.vlgmr.msra.gmra.mxu0 %v2674_v41  ;;  %v1842_v34 = vor.u32 %v2308_v24, %v1839_v25  ;;  %v2332_v8 = vld [vmem:[#allocation8 + $0x28c] sm:$0xf]  ;;  %v1775_v18 = vld [vmem:[#allocation8 + $0x158] sm:$0xf0] }
  0xbb   :  { %1150 = vmatpush.bf16.msrb.mxu2 %v1950_v31  ;;  %1091 = vmatmul.bf16.vlgmr.msra.gmra.mxu1 %v2676_v46  ;;  %v2344_v31 = vld [vmem:[#allocation8 + $0x2ec] sm:$0xf]  ;;  %v1759_v30 = vld [vmem:[#allocation8 + $0x138] sm:$0xf0] }
  0xbc   :  { %1163 = vmatpush.bf16.msrb.mxu3 %v2078_v32  ;;  %1126 = vmatpush.bf16.msrb.mxu0 %v1662_v35  ;;  %v1983_v32 = vld [vmem:[#allocation8 + $0x2f8] sm:$0xf0]  ;;  %v2376_v35 = vld [vmem:[#allocation8 + $0x3ec] sm:$0xf] }
  0xbd   :  { %1139 = vmatpush.bf16.msrb.mxu1 %v1790_v36  ;;  %v2111_v36 = vld [vmem:[#allocation8 + $0x3f8] sm:$0xf0]  ;;  %v2292_v17 = vld [vmem:[#allocation8 + $0x14c] sm:$0xf] }
  0xbe   :  { %v2328_v21 = vld [vmem:[#allocation8 + $0x26c] sm:$0xf]  ;;  %v1778_v24 = vor.u32 %v2292_v17, %v1775_v18  ;;  %v2386_v53 = vld [vmem:[#allocation11 + $0x38] sm:$0xff]  ;;  %v2387_v17 = vld [vmem:[#allocation11 + $0x40] sm:$0xff] }
  0xbf   :  { %1151 = vmatpush.bf16.msrb.mxu2 %v1934_v44  ;;  %v1986_v44 = vor.u32 %v2344_v31, %v1983_v32  ;;  %v2360_v25 = vld [vmem:[#allocation8 + $0x36c] sm:$0xf]  ;;  %v1999_v59 = vld [vmem:[#allocation8 + $0x318] sm:$0xf0]  ;;  %v2399_v18 = vld [vmem:[#allocation11 + $0xa0] sm:$0xff] }
  0xc0   :  { %1164 = vmatpush.bf16.msrb.mxu3 %v2062_v45  ;;  %1127 = vmatpush.bf16.msrb.mxu0 %v1646_v49  ;;  %v2114_v45 = vor.u32 %v2376_v35, %v2111_v36  ;;  %v1698_v49 = vor.u32 %v2272_v37, %v1695_v39  ;;  %v2288_v29 = vld [vmem:[#allocation8 + $0x12c] sm:$0xf]  ;;  %v1634_v35 = vor.u32 %v2256_v27, %v1631_v28  ;;  %v2394_v1 = vld [vmem:[#allocation11 + $0x78] sm:$0xff] }
  0xc1   :  { %1140 = vmatpush.bf16.msrb.mxu1 %v1774_v50  ;;  %v1826_v50 = vor.u32 %v2304_v40, %v1823_v42  ;;  %v1762_v36 = vor.u32 %v2288_v29, %v1759_v30  ;;  %v2356_v37 = vld [vmem:[#allocation8 + $0x34c] sm:$0xf]  ;;  %v1615_v40 = vld [vmem:[#allocation8 + $0x18] sm:$0xf0] }
  0xc2   :  { %1104 = vmatmul.bf16.vlgmr.msra.gmra.mxu2 %v2680_v4  ;;  %v2252_v39 = vld [vmem:[#allocation8 + $0xc] sm:$0xf]  ;;  %v2382_v2 = vld [vmem:[#allocation11 + $0x18] sm:$0xff] }
  0xc3   :  { %1117 = vmatmul.bf16.vlgmr.msra.gmra.mxu3 %v2682_v10  ;;  %1152 = vmatpush.bf16.msrb.mxu2 %v1918_v57  ;;  %v1970_v57 = vor.u32 %v2340_v47, %v1967_v48  ;;  %v2284_v42 = vld [vmem:[#allocation8 + $0x10c] sm:$0xf]  ;;  %v1887_v48 = vld [vmem:[#allocation8 + $0x238] sm:$0xf0] }
  0xc4   :  { %1165 = vmatpush.bf16.msrb.mxu3 %v2046_v58  ;;  %1128 = vmatpush.bf16.msrb.mxu0 %v1630_v62  ;;  %v2098_v58 = vor.u32 %v2372_v51, %v2095_v52  ;;  %v1810_v62 = vor.u32 %v2300_v55, %v1807_v56  ;;  %v2320_v47 = vld [vmem:[#allocation8 + $0x22c] sm:$0xf]  ;;  %v2015_v52 = vld [vmem:[#allocation8 + $0x338] sm:$0xf0] }
  0xc5   :  { %1141 = vmatpush.bf16.msrb.mxu1 %v1758_v63  ;;  %v2368_v63 = vld [vmem:[#allocation8 + $0x3ac] sm:$0xf]  ;;  %v1890_v54 = vor.u32 %v2320_v47, %v1887_v48 }
  0xc6   :  { %v2352_v51 = vld [vmem:[#allocation8 + $0x32c] sm:$0xf] }
  0xc7   :  { %1153 = vmatpush.bf16.msrb.mxu2 %v1902_v7  ;;  %v2082_v7 = vor.u32 %v2368_v63, %v2079_v0  ;;  %v2018_v55 = vor.u32 %v2352_v51, %v2015_v52  ;;  %v2316_v56 = vld [vmem:[#allocation8 + $0x20c] sm:$0xf]  ;;  %v2383_v0 = vld [vmem:[#allocation11 + $0x20] sm:$0xff] }
  0xc8   :  { %1166 = vmatpush.bf16.msrb.mxu3 %v2030_v12  ;;  %1129 = vmatpush.bf16.msrb.mxu0 %v1614_v15  ;;  %v1794_v12 = vor.u32 %v2296_v3, %v1791_v5  ;;  %v2260_v15 = vld [vmem:[#allocation8 + $0x4c] sm:$0xf]  ;;  %v2381_v3 = vld [vmem:[#allocation11 + $0x10] sm:$0xff] }
  0xc9   :  { %1142 = vmatpush.bf16.msrb.mxu1 %v1742_v16  ;;  %v1647_v16 = vld [vmem:[#allocation8 + $0x58] sm:$0xf0]  ;;  %v2384_v63 = vld [vmem:[#allocation11 + $0x28] sm:$0xff] }
  0xca   :  { %v1650_v23 = vor.u32 %v2260_v15, %v1647_v16  ;;  %v2392_v5 = vld [vmem:[#allocation11 + $0x68] sm:$0xff] }
  0xcb   :  { %1154 = vmatpush.bf16.msrb.mxu2 %v1886_v22  ;;  %1130 = vmatmul.bf16.vlgmr.msrb.gmra.mxu0 %v2674_v41  ;;  %v1919_v22 = vld [vmem:[#allocation8 + $0x278] sm:$0xf0]  ;;  %v2396_v28 = vld [vmem:[#allocation11 + $0x88] sm:$0xff] }
  0xcc   :  { %1174 = vmatpush.bf16.msra.mxu0 %v1730_v19  ;;  %1167 = vmatpush.bf16.msrb.mxu3 %v2014_v26  ;;  %v1938_v19 = vor.u32 %v2332_v8, %v1935_v9  ;;  %v2047_v26 = vld [vmem:[#allocation8 + $0x378] sm:$0xf0]  ;;  %v1922_v31 = vor.u32 %v2328_v21, %v1919_v22  ;;  %v2389_v8 = vld [vmem:[#allocation11 + $0x50] sm:$0xff] }
  0xcd   :  { %1187 = vmatpush.bf16.msra.mxu1 %v1858_v20  ;;  %v2066_v20 = vor.u32 %v2364_v13, %v2063_v14  ;;  %v2050_v32 = vor.u32 %v2360_v25, %v2047_v26  ;;  %v2401_v9 = vld [vmem:[#allocation11 + $0xb0] sm:$0xff]  ;;  %v2400_v13 = vld [vmem:[#allocation11 + $0xa8] sm:$0xff] }
  0xce   :  { %1143 = vmatmul.bf16.vlgmr.msrb.gmra.mxu1 %v2676_v46 }
  0xcf   :  { %1155 = vmatpush.bf16.msrb.mxu2 %v1870_v38  ;;  %v2031_v38 = vld [vmem:[#allocation8 + $0x358] sm:$0xf0] }
  0xd0   :  { %1175 = vmatpush.bf16.msra.mxu0 %v1714_v33  ;;  %1168 = vmatpush.bf16.msrb.mxu3 %v1998_v43  ;;  %v2324_v33 = vld [vmem:[#allocation8 + $0x24c] sm:$0xf]  ;;  %v1743_v43 = vld [vmem:[#allocation8 + $0x118] sm:$0xf0] }
  0xd1   :  { %1188 = vmatpush.bf16.msra.mxu1 %v1842_v34  ;;  %v1903_v34 = vld [vmem:[#allocation8 + $0x258] sm:$0xf0] }
  0xd2   :  { %1156 = vmatmul.bf16.vlgmr.msrb.gmra.mxu2 %v2680_v4 }
  0xd3   :  { %1200 = vmatpush.bf16.msra.mxu2 %v1986_v44  ;;  %1169 = vmatmul.bf16.vlgmr.msrb.gmra.mxu3 %v2682_v10  ;;  %v1906_v44 = vor.u32 %v2324_v33, %v1903_v34  ;;  %v2395_v33 = vld [vmem:[#allocation11 + $0x80] sm:$0xff]  ;;  %v2410_v34 = vld [vmem:[#allocation11 + $0xf8] sm:$0xff] }
  0xd4   :  { %1213 = vmatpush.bf16.msra.mxu3 %v2114_v45  ;;  %1176 = vmatpush.bf16.msra.mxu0 %v1698_v49  ;;  %v2034_v45 = vor.u32 %v2356_v37, %v2031_v38  ;;  %v1618_v49 = vor.u32 %v2252_v39, %v1615_v40  ;;  %v2409_v39 = vld [vmem:[#allocation11 + $0xf0] sm:$0xff] }
  0xd5   :  { %1189 = vmatpush.bf16.msra.mxu1 %v1826_v50  ;;  %v1746_v50 = vor.u32 %v2284_v42, %v1743_v43 }
  0xd7   :  { %1201 = vmatpush.bf16.msra.mxu2 %v1970_v57  ;;  %v1871_v57 = vld [vmem:[#allocation8 + $0x218] sm:$0xf0] }
  0xd8   :  { %1214 = vmatpush.bf16.msra.mxu3 %v2098_v58  ;;  %1177 = vmatpush.bf16.msra.mxu0 %v1682_v61  ;;  %v2348_v58 = vld [vmem:[#allocation8 + $0x30c] sm:$0xf]  ;;  %v1874_v61 = vor.u32 %v2316_v56, %v1871_v57 }
  0xd9   :  { %1190 = vmatpush.bf16.msra.mxu1 %v1810_v62  ;;  %v2002_v62 = vor.u32 %v2348_v58, %v1999_v59 }
  0xdb   :  { %1202 = vmatpush.bf16.msra.mxu2 %v1954_v6  ;;  %v2379_v6 = vld [vmem:[#allocation11] sm:$0xff] }
  0xdc   :  { %1215 = vmatpush.bf16.msra.mxu3 %v2082_v7  ;;  %1178 = vmatpush.bf16.msra.mxu0 %v1666_v11  ;;  %v2391_v7 = vld [vmem:[#allocation11 + $0x60] sm:$0xff]  ;;  %v2698_v11 = vld [vmem:[#allocation10] sm:$0xf] }
  0xdd   :  { %1191 = vmatpush.bf16.msra.mxu1 %v1794_v12  ;;  %v2388_v12 = vld [vmem:[#allocation11 + $0x48] sm:$0xff]  ;;  %v370_v16 = vperm.slane %v2698_v11, 0  ;;  %v372_v57 = vperm.slane %v2698_v11, 2 }
  0xdf   :  { %1203 = vmatpush.bf16.msra.mxu2 %v1938_v19 }
  0xe0   :  { %1216 = vmatpush.bf16.msra.mxu3 %v2066_v20  ;;  %1179 = vmatpush.bf16.msra.mxu0 %v1650_v23  ;;  %v2398_v20 = vld [vmem:[#allocation11 + $0x98] sm:$0xff] }
  0xe1   :  { %1192 = vmatpush.bf16.msra.mxu1 %v1778_v24  ;;  %v2397_v24 = vld [vmem:[#allocation11 + $0x90] sm:$0xff] }
  0xe3   :  { %1204 = vmatpush.bf16.msra.mxu2 %v1922_v31 }
  0xe4   :  { %1217 = vmatpush.bf16.msra.mxu3 %v2050_v32  ;;  %1180 = vmatpush.bf16.msra.mxu0 %v1634_v35 }
  0xe5   :  { %1193 = vmatpush.bf16.msra.mxu1 %v1762_v36  ;;  %v371_v36 = vperm.slane %v2698_v11, 1 }
  0xe7   :  { %1205 = vmatpush.bf16.msra.mxu2 %v1906_v44  ;;  %v2408_v44 = vld [vmem:[#allocation11 + $0xe8] sm:$0xff] }
  0xe8   :  { %1218 = vmatpush.bf16.msra.mxu3 %v2034_v45  ;;  %1181 = vmatpush.bf16.msra.mxu0 %v1618_v49 }
  0xe9   :  { %1194 = vmatpush.bf16.msra.mxu1 %v1746_v50  ;;  %v2407_v50 = vld [vmem:[#allocation11 + $0xe0] sm:$0xff] }
  0xeb   :  { %1206 = vmatpush.bf16.msra.mxu2 %v1890_v54  ;;  %1182 = vmatmul.bf16.vlgmr.msra.gmra.mxu0 %v2674_v41  ;;  %v2393_v41 = vld [vmem:[#allocation11 + $0x70] sm:$0xff] }
  0xec   :  { %1494 = vmatpush.bf16.msrb.mxu0 %v2386_v53  ;;  %1219 = vmatpush.bf16.msra.mxu3 %v2018_v55  ;;  %v2406_v53 = vld [vmem:[#allocation11 + $0xd8] sm:$0xff] }
  0xed   :  { %1195 = vmatmul.bf16.vlgmr.msra.gmra.mxu1 %v2676_v46  ;;  %v2380_v46 = vld [vmem:[#allocation11 + $0x8] sm:$0xff] }
  0xee   :  { %1507 = vmatpush.bf16.msrb.mxu1 %v2394_v1 }
  0xef   :  { %1207 = vmatpush.bf16.msra.mxu2 %v1874_v61 }
  0xf0   :  { %1495 = vmatpush.bf16.msrb.mxu0 %v2385_v60  ;;  %1220 = vmatpush.bf16.msra.mxu3 %v2002_v62  ;;  %v2405_v60 = vld [vmem:[#allocation11 + $0xd0] sm:$0xff] }
  0xf2   :  { %1208 = vmatmul.bf16.vlgmr.msra.gmra.mxu2 %v2680_v4  ;;  %1508 = vmatpush.bf16.msrb.mxu1 %v2393_v41  ;;  %v2390_v4 = vld [vmem:[#allocation11 + $0x58] sm:$0xff] }
  0xf3   :  { %1221 = vmatmul.bf16.vlgmr.msra.gmra.mxu3 %v2682_v10  ;;  %v2402_v10 = vld [vmem:[#allocation11 + $0xb8] sm:$0xff] }
  0xf4   :  { %1496 = vmatpush.bf16.msrb.mxu0 %v2384_v63  ;;  %1520 = vmatpush.bf16.msrb.mxu2 %v2402_v10 }
  0xf5   :  { %1533 = vmatpush.bf16.msrb.mxu3 %v2410_v34 }
  0xf6   :  { %1509 = vmatpush.bf16.msrb.mxu1 %v2392_v5 }
  0xf8   :  { %1497 = vmatpush.bf16.msrb.mxu0 %v2383_v0  ;;  %1521 = vmatpush.bf16.msrb.mxu2 %v2401_v9  ;;  %v2404_v0 = vld [vmem:[#allocation11 + $0xc8] sm:$0xff] }
  0xf9   :  { %1534 = vmatpush.bf16.msrb.mxu3 %v2409_v39 }
  0xfa   :  { %1510 = vmatpush.bf16.msrb.mxu1 %v2391_v7 }
  0xfc   :  { %1498 = vmatpush.bf16.msrb.mxu0 %v2382_v2  ;;  %1522 = vmatpush.bf16.msrb.mxu2 %v2400_v13 }
  0xfd   :  { %1535 = vmatpush.bf16.msrb.mxu3 %v2408_v44 }
  0xfe   :  { %1511 = vmatpush.bf16.msrb.mxu1 %v2390_v4 }
 0x100   :  { %1499 = vmatpush.bf16.msrb.mxu0 %v2381_v3  ;;  %1523 = vmatpush.bf16.msrb.mxu2 %v2399_v18 }
 0x101   :  { %1536 = vmatpush.bf16.msrb.mxu3 %v2407_v50 }
 0x102   :  { %1512 = vmatpush.bf16.msrb.mxu1 %v2389_v8 }
 0x104   :  { %1500 = vmatpush.bf16.msrb.mxu0 %v2380_v46  ;;  %1524 = vmatpush.bf16.msrb.mxu2 %v2398_v20  ;;  %v2403_v46 = vld [vmem:[#allocation11 + $0xc0] sm:$0xff] }
 0x105   :  { %1537 = vmatpush.bf16.msrb.mxu3 %v2406_v53 }
 0x106   :  { %1513 = vmatpush.bf16.msrb.mxu1 %v2388_v12  ;;  %v373_v12 = vperm.slane %v2698_v11, 3  ;;  %v2422_v11 = vld [vmem:[%s2716_s6] ss:$0 sm:$0xff] }
 0x108   :  { %1501 = vmatpush.bf16.msrb.mxu0 %v2379_v6  ;;  %1525 = vmatpush.bf16.msrb.mxu2 %v2397_v24 }
 0x109   :  { %1538 = vmatpush.bf16.msrb.mxu3 %v2405_v60 }
 0x10a   :  { %1514 = vmatpush.bf16.msrb.mxu1 %v2387_v17 }
 0x10c   :  { %1526 = vmatpush.bf16.msrb.mxu2 %v2396_v28 }
 0x10d   :  { %1539 = vmatpush.bf16.msrb.mxu3 %v2404_v0 }
 0x110   :  { %1527 = vmatpush.bf16.msrb.mxu2 %v2395_v33 }
 0x111   :  { %1540 = vmatpush.bf16.msrb.mxu3 %v2403_v46 }
 0x127   :  { %v1027_v14 = vpop.f32.mrf.mxu0 }
 0x128   :  { %v1040_v15 = vpop.f32.mrf.mxu1  ;;  %v1028_v19 = vadd.f32 %v1027_v14, %v370_v16 }
 0x12a   :  { %v1041_v23 = vadd.f32 %v1040_v15, %v1028_v19 }
 0x12f   :  { %v1029_v21 = vpop.f32.mrf.mxu0 }
 0x130   :  { %v1042_v22 = vpop.f32.mrf.mxu1 }
 0x135   :  { %v1053_v25 = vpop.f32.mrf.mxu2 }
 0x136   :  { %v1054_v26 = vadd.f32 %v1053_v25, %v1041_v23  ;;  %v1066_v27 = vpop.f32.mrf.mxu3 }
 0x137   :  { %v1079_v30 = vpop.f32.mrf.mxu0 }
 0x138   :  { %v1067_v29 = vadd.f32 %v1066_v27, %v1054_v26  ;;  %v1092_v31 = vpop.f32.mrf.mxu1  ;;  %v1080_v40 = vadd.f32 %v1079_v30, %v371_v36 }
 0x13a   :  { %v1226_v32 = vmax.f32 %v1067_v29, 0.0  ;;  %v1093_v45 = vadd.f32 %v1092_v31, %v1080_v40 }
 0x13c   :  { %v1230_v35 = vpack.c.bf16 %v1226_v32, %v1226_v32 }
 0x13d   :  { %v1055_v37 = vpop.f32.mrf.mxu2 }
 0x13e   :  { %v1068_v38 = vpop.f32.mrf.mxu3  ;;  %1502 = vmatmul.bf16.vlgmr.msrb.gmra.mxu0 %v1230_v35 }
 0x13f   :  { %v1081_v42 = vpop.f32.mrf.mxu0 }
 0x140   :  { %v1094_v43 = vpop.f32.mrf.mxu1 }
 0x145   :  { %v1105_v47 = vpop.f32.mrf.mxu2 }
 0x146   :  { %v1106_v48 = vadd.f32 %v1105_v47, %v1093_v45  ;;  %v1118_v49 = vpop.f32.mrf.mxu3 }
 0x148   :  { %v1119_v51 = vadd.f32 %v1118_v49, %v1106_v48  ;;  %v1131_v52 = vpop.f32.mrf.mxu0 }
 0x149   :  { %v1132_v61 = vadd.f32 %v1131_v52, %v372_v57 }
 0x14a   :  { %v1227_v54 = vmax.f32 %v1119_v51, 0.0 }
 0x14b   :  { %v1144_v55 = vpop.f32.mrf.mxu1 }
 0x14c   :  { %v1231_v56 = vpack.c.bf16 %v1227_v54, %v1227_v54  ;;  %v1145_v1 = vadd.f32 %v1144_v55, %v1132_v61 }
 0x14d   :  { %v1107_v58 = vpop.f32.mrf.mxu2 }
 0x14e   :  { %v1120_v59 = vpop.f32.mrf.mxu3  ;;  %1515 = vmatmul.bf16.vlgmr.msrb.gmra.mxu1 %v1231_v56 }
 0x150   :  { %v1133_v62 = vpop.f32.mrf.mxu0 }
 0x153   :  { %v1146_v63 = vpop.f32.mrf.mxu1 }
 0x155   :  { %v1157_v2 = vpop.f32.mrf.mxu2 }
 0x156   :  { %v1170_v3 = vpop.f32.mrf.mxu3  ;;  %v1158_v41 = vadd.f32 %v1157_v2, %v1145_v1 }
 0x158   :  { %v1171_v5 = vadd.f32 %v1170_v3, %v1158_v41 }
 0x15a   :  { %v1228_v6 = vmax.f32 %v1171_v5, 0.0 }
 0x15c   :  { %v1232_v7 = vpack.c.bf16 %v1228_v6, %v1228_v6 }
 0x15d   :  { %v1159_v4 = vpop.f32.mrf.mxu2 }
 0x15e   :  { %v1172_v10 = vpop.f32.mrf.mxu3  ;;  %1528 = vmatmul.bf16.vlgmr.msrb.gmra.mxu2 %v1232_v7 }
 0x168   :  { %v1183_v8 = vpop.f32.mrf.mxu0 }
 0x169   :  { %v1184_v13 = vadd.f32 %v1183_v8, %v373_v12 }
 0x16a   :  { %v1196_v9 = vpop.f32.mrf.mxu1 }
 0x16b   :  { %v1197_v16 = vadd.f32 %v1196_v9, %v1184_v13 }
 0x170   :  { %v1185_v14 = vpop.f32.mrf.mxu0 }
 0x172   :  { %v1198_v15 = vpop.f32.mrf.mxu1 }
 0x175   :  { %v1209_v17 = vpop.f32.mrf.mxu2 }
 0x176   :  { %v1210_v18 = vadd.f32 %v1209_v17, %v1197_v16  ;;  %v1222_v19 = vpop.f32.mrf.mxu3 }
 0x178   :  { %v1223_v20 = vadd.f32 %v1222_v19, %v1210_v18 }
 0x17a   :  { %v1229_v21 = vmax.f32 %v1223_v20, 0.0 }
 0x17c   :  { %v1233_v22 = vpack.c.bf16 %v1229_v21, %v1229_v21 }
 0x17d   :  { %v1211_v23 = vpop.f32.mrf.mxu2 }
 0x17e   :  { %v1224_v24 = vpop.f32.mrf.mxu3  ;;  %1541 = vmatmul.bf16.vlgmr.msrb.gmra.mxu3 %v1233_v22 }
 0x1bb   :  { %v1503_v25 = vpop.f32.mrf.mxu0 }
 0x1bc   :  { %v1504_v31 = vadd.f32 %v2422_v11, %v1503_v25 }
 0x1c3   :  { %v1505_v26 = vpop.f32.mrf.mxu0 }
 0x1cb   :  { %v1516_v27 = vpop.f32.mrf.mxu1 }
 0x1cc   :  { %v1517_v32 = vadd.f32 %v1516_v27, %v1504_v31 }
 0x1d3   :  { %v1518_v28 = vpop.f32.mrf.mxu1 }
 0x1e1   :  { %v1529_v29 = vpop.f32.mrf.mxu2 }
 0x1e2   :  { %v1530_v33 = vadd.f32 %v1529_v29, %v1517_v32 }
 0x1e9   :  { %v1531_v30 = vpop.f32.mrf.mxu2 }
 0x201   :  { %v1542_v34 = vpop.f32.mrf.mxu3 }
 0x202   :  { %v1543_v35 = vadd.f32 %v1542_v34, %v1530_v33 }
 0x204   :  { %1546 = vst [vmem:[#allocation13] sm:$0xff] %v1543_v35 }
 0x205   :  { %1557 = dma.vmem_to_hbm [thread:$0]  %s1553_s9, 128, %s1555_s12, [#allocation4]  }
 0x209   :  { %v1544_v36 = vpop.f32.mrf.mxu3 }
 0x20a   :  { %2599 = dma.done.wait [#allocation4], 128  }
 0x20b   :  { %2600 = vsyncadd [#allocation4], 4294967168 }
 0x20c   :  { %1562 = vsyncpa [#allocation3], 1 }
 0x20d   :  { %1563 = vsyncpa [#allocation6], 1 }
 0x20e   :  { %1564 = vsyncpa [#allocation9], 1 }
 0x20f   :  { %1565 = vsyncpa [#allocation12], 1 }
 0x210   :  { %1566 = vsyncpa [#allocation4], 1 }

</bundles_post_ra>
